<compile_context>
chip_gen: v7x
topology: tpu7x:2x2x1
jax: 0.10.0
libtpu: 0.0.40
codegen_flags: <defaults>
</compile_context>

<pallas_src>
import jax
import jax.numpy as jnp
from jax import lax
from jax.experimental import pallas as pl
from jax.experimental.pallas import tpu as pltpu

B = 8              # batch size
H = 128            # hidden size (bert-base would be 768; small synthetic size)
TEMPERATURE = 0.05
INV_TEMP = 1.0 / TEMPERATURE
EPS = 1e-8         # F.cosine_similarity eps

# contract axis 1 of both operands (== lhs @ rhs.T, with no transposed copy)
_CONTRACT_LAST = (((1,), (1,)), ((), ()))


def simcse_kernel(x_ref, w_ref, b_ref, labels_ref, loss_ref, scores_ref):
    # TODO(synk): the BERT encoder itself is not implemented; x_ref holds its
    # CLS outputs for both sentence views (rows [0,B) = view 1, [B,2B) = view 2).
    x = x_ref[...]        # (2B, H)
    w = w_ref[...]        # (H, H)  nn.Linear weight, (out, in) layout
    b = b_ref[...]        # (1, H)

    # Fused dense + tanh head for both views in a single MXU pass.
    # dot_general contracting axis 1 of both == x @ w.T without building w.T.
    z = jnp.tanh(
        lax.dot_general(x, w, _CONTRACT_LAST, preferred_element_type=jnp.float32) + b)
    z1 = z[:B, :]          # (B, H)  sublane-aligned slices (B == 8) — free
    z2 = z[B:, :]          # (B, H)

    # Transposed pairwise similarity: simT[j, i] = cos(z1[i], z2[j]).
    # Transposed orientation => all later reductions are over axis 0 and emit
    # lane-dense (1, B) rows; no z.T / scores transposes anywhere.
    dotsT = lax.dot_general(z2, z1, _CONTRACT_LAST,
                            preferred_element_type=jnp.float32)          # (B, B)

    ss = jnp.sum(z * z, axis=1, keepdims=True)                           # (2B, 1)
    ss1 = ss[:B, :]                                                      # (B, 1)
    ss2 = ss[B:, :]                                                      # (B, 1)
    # 1 / max(||z1_i||*||z2_j||, EPS) == min(rsqrt(ss1*ss2), 1/EPS): EUP rsqrt + VPU,
    # keeps F.cosine_similarity's clamp-on-product-of-norms semantics.
    inv_denom = jnp.minimum(lax.rsqrt(ss2 * ss1.T), 1.0 / EPS)           # (B, B)
    simT = dotsT * inv_denom

    # one_hot(labels)^T from a lane-dense label row: onehot_t[j, i] = (j == labels[i]).
    row = lax.broadcasted_iota(jnp.int32, (B, B), 0)                     # (B, B)
    labels_b = jnp.broadcast_to(labels_ref[...], (B, B))                 # (B, B)
    onehot_t = (row == labels_b).astype(jnp.float32)

    # cross entropy over sim / temperature (mean reduction), per-column (== per query).
    logits_t = simT * INV_TEMP
    m = jnp.max(logits_t, axis=0, keepdims=True)                               # (1, B)
    lse = m + jnp.log(jnp.sum(jnp.exp(logits_t - m), axis=0, keepdims=True))   # (1, B)

    # positive scores: sim[i, labels[i]], emitted directly as a lane-dense row.
    scores = jnp.sum(simT * onehot_t, axis=0, keepdims=True)                   # (1, B)
    picked = scores * INV_TEMP                                                 # (1, B)

    loss_ref[...] = (jnp.sum(lse - picked) * (1.0 / B)).reshape(1, 1)
    scores_ref[...] = scores


@jax.jit
def simcse_forward(x1, x2, w, b, labels):
    x = jnp.concatenate([x1, x2], axis=0)                 # (2B, H) fused head LHS
    labels_row = labels.astype(jnp.int32).reshape(1, B)   # (1, B) lane-dense row
    loss, scores = pl.pallas_call(
        simcse_kernel,
        out_shape=(
            jax.ShapeDtypeStruct((1, 1), jnp.float32),    # loss
            jax.ShapeDtypeStruct((1, B), jnp.float32),    # positive scores (lane row)
        ),
        in_specs=[
            pl.BlockSpec(memory_space=pltpu.MemorySpace.VMEM),   # x  (2B, H)
            pl.BlockSpec(memory_space=pltpu.MemorySpace.VMEM),   # w  (H, H)
            pl.BlockSpec(memory_space=pltpu.MemorySpace.VMEM),   # b  (1, H)
            pl.BlockSpec(memory_space=pltpu.MemorySpace.VMEM),   # labels (1, B)
        ],
        out_specs=(
            pl.BlockSpec(memory_space=pltpu.MemorySpace.VMEM),
            pl.BlockSpec(memory_space=pltpu.MemorySpace.VMEM),
        ),
    )(x, w, b.reshape(1, H), labels_row)
    return loss[0, 0], scores[0, :]


def reference_forward(x1, x2, w, b, labels):
    """Pure-JAX reference mirroring the PyTorch semantics."""
    z1 = jnp.tanh(x1 @ w.T + b)
    z2 = jnp.tanh(x2 @ w.T + b)
    n1 = jnp.linalg.norm(z1, axis=1, keepdims=True)
    n2 = jnp.linalg.norm(z2, axis=1, keepdims=True)
    sim = (z1 @ z2.T) / jnp.maximum(n1 * n2.T, EPS)
    logits = sim / TEMPERATURE
    lse = jax.scipy.special.logsumexp(logits, axis=1)
    picked = logits[jnp.arange(B), labels]
    loss = jnp.mean(lse - picked)
    scores = sim[jnp.arange(B), labels]
    return loss, scores


if __name__ == "__main__":
    key = jax.random.PRNGKey(0)
    k1, k2, k3, k4 = jax.random.split(key, 4)

    # Synthetic encoder CLS outputs (stand-in for BERT last_hidden_state[:, 0, :])
    x1 = jax.random.normal(k1, (B, H), dtype=jnp.float32)
    x2 = jax.random.normal(k2, (B, H), dtype=jnp.float32)

    # Deterministic nn.Linear(hidden, hidden) init: U(-1/sqrt(H), 1/sqrt(H))
    bound = 1.0 / (H ** 0.5)
    w = jax.random.uniform(k3, (H, H), jnp.float32, minval=-bound, maxval=bound)
    b = jax.random.uniform(k4, (H,), jnp.float32, minval=-bound, maxval=bound)

    # Standard SimCSE in-batch labels: positive of example i is column i
    labels = jnp.arange(B, dtype=jnp.int32)

    loss, scores = simcse_forward(x1, x2, w, b, labels)
    jax.block_until_ready((loss, scores))

    ref_loss, ref_scores = reference_forward(x1, x2, w, b, labels)
    assert jnp.allclose(loss, ref_loss, atol=1e-4, rtol=1e-4)
    assert jnp.allclose(scores, ref_scores, atol=1e-4, rtol=1e-4)

    print("KERNEL_OK")
</pallas_src>

<mosaic_0001>
module attributes {stable_mosaic.version = 11 : i64} {
  func.func @simcse_kernel(%arg0: memref<16x128xf32, #tpu.memory_space<vmem>>, %arg1: memref<128x128xf32, #tpu.memory_space<vmem>>, %arg2: memref<1x128xf32, #tpu.memory_space<vmem>>, %arg3: memref<1x8xi32, #tpu.memory_space<vmem>>, %arg4: memref<1x1xf32, #tpu.memory_space<vmem>>, %arg5: memref<1x8xf32, #tpu.memory_space<vmem>>) attributes {dimension_semantics = [], scalar_prefetch = 0 : i64, scratch_operands = 0 : i64, tpu.core_type = #tpu.core_type<tc>} {
    %c0 = arith.constant 0 : index
    %c0_0 = arith.constant 0 : index
    %0 = vector.load %arg0[%c0, %c0_0] : memref<16x128xf32, #tpu.memory_space<vmem>>, vector<16x128xf32>
    %c0_1 = arith.constant 0 : index
    %c0_2 = arith.constant 0 : index
    %1 = vector.load %arg1[%c0_1, %c0_2] : memref<128x128xf32, #tpu.memory_space<vmem>>, vector<128x128xf32>
    %c0_3 = arith.constant 0 : index
    %c0_4 = arith.constant 0 : index
    %2 = vector.load %arg2[%c0_3, %c0_4] : memref<1x128xf32, #tpu.memory_space<vmem>>, vector<1x128xf32>
    %cst = arith.constant dense<0.000000e+00> : vector<16x128xf32>
    %3 = tpu.matmul %0, %1, %cst {dimension_numbers = #tpu.dot_dimension_numbers<[1], [1], [0], [0], [0, 0, 1, 0], [], []>} : vector<16x128xf32>, vector<128x128xf32>, vector<16x128xf32> -> vector<16x128xf32>
    %4 = vector.broadcast %2 : vector<1x128xf32> to vector<16x128xf32>
    %5 = arith.addf %3, %4 : vector<16x128xf32>
    %6 = math.tanh %5 : vector<16x128xf32>
    %7 = vector.extract_strided_slice %6 {offsets = [0, 0], sizes = [8, 128], strides = [1, 1]} : vector<16x128xf32> to vector<8x128xf32>
    %8 = vector.extract_strided_slice %6 {offsets = [8, 0], sizes = [8, 128], strides = [1, 1]} : vector<16x128xf32> to vector<8x128xf32>
    %cst_5 = arith.constant dense<0.000000e+00> : vector<8x8xf32>
    %9 = tpu.matmul %8, %7, %cst_5 {dimension_numbers = #tpu.dot_dimension_numbers<[1], [1], [0], [0], [0, 0, 1, 0], [], []>} : vector<8x128xf32>, vector<8x128xf32>, vector<8x8xf32> -> vector<8x8xf32>
    %10 = arith.mulf %6, %6 : vector<16x128xf32>
    %cst_6 = arith.constant dense<0.000000e+00> : vector<16xf32>
    %11 = vector.multi_reduction <add>, %10, %cst_6 [1] : vector<16x128xf32> to vector<16xf32>
    %12 = vector.shape_cast %11 : vector<16xf32> to vector<16x1xf32>
    %13 = vector.extract_strided_slice %12 {offsets = [0, 0], sizes = [8, 1], strides = [1, 1]} : vector<16x1xf32> to vector<8x1xf32>
    %14 = vector.extract_strided_slice %12 {offsets = [8, 0], sizes = [8, 1], strides = [1, 1]} : vector<16x1xf32> to vector<8x1xf32>
    %15 = tpu.transpose %13, [1, 0] : vector<8x1xf32> -> vector<1x8xf32>
    %16 = vector.broadcast %14 : vector<8x1xf32> to vector<8x8xf32>
    %17 = vector.broadcast %15 : vector<1x8xf32> to vector<8x8xf32>
    %18 = arith.mulf %16, %17 : vector<8x8xf32>
    %19 = math.rsqrt %18 : vector<8x8xf32>
    %cst_7 = arith.constant 1.000000e+08 : f32
    %20 = vector.broadcast %cst_7 : f32 to vector<8x8xf32>
    %21 = arith.minimumf %19, %20 : vector<8x8xf32>
    %22 = arith.mulf %9, %21 : vector<8x8xf32>
    %23 = tpu.iota {dimensions = array<i32: 0>} : vector<8x8xi32>
    %c0_8 = arith.constant 0 : index
    %c0_9 = arith.constant 0 : index
    %24 = vector.load %arg3[%c0_8, %c0_9] : memref<1x8xi32, #tpu.memory_space<vmem>>, vector<1x8xi32>
    %25 = vector.shape_cast %24 : vector<1x8xi32> to vector<1x8xi32>
    %26 = vector.broadcast %25 : vector<1x8xi32> to vector<8x8xi32>
    %27 = arith.cmpi eq, %23, %26 : vector<8x8xi32>
    %28 = arith.extui %27 : vector<8x8xi1> to vector<8x8xi32>
    %29 = arith.sitofp %28 : vector<8x8xi32> to vector<8x8xf32>
    %cst_10 = arith.constant 2.000000e+01 : f32
    %30 = vector.broadcast %cst_10 : f32 to vector<8x8xf32>
    %31 = arith.mulf %22, %30 : vector<8x8xf32>
    %cst_11 = arith.constant dense<0xFF800000> : vector<8xf32>
    %32 = vector.multi_reduction <maximumf>, %31, %cst_11 [0] : vector<8x8xf32> to vector<8xf32>
    %33 = vector.shape_cast %32 : vector<8xf32> to vector<1x8xf32>
    %34 = vector.broadcast %33 : vector<1x8xf32> to vector<8x8xf32>
    %35 = arith.subf %31, %34 : vector<8x8xf32>
    %36 = math.exp %35 : vector<8x8xf32>
    %cst_12 = arith.constant dense<0.000000e+00> : vector<8xf32>
    %37 = vector.multi_reduction <add>, %36, %cst_12 [0] : vector<8x8xf32> to vector<8xf32>
    %38 = vector.shape_cast %37 : vector<8xf32> to vector<1x8xf32>
    %39 = math.log %38 : vector<1x8xf32>
    %40 = arith.addf %33, %39 : vector<1x8xf32>
    %41 = arith.mulf %22, %29 : vector<8x8xf32>
    %cst_13 = arith.constant dense<0.000000e+00> : vector<8xf32>
    %42 = vector.multi_reduction <add>, %41, %cst_13 [0] : vector<8x8xf32> to vector<8xf32>
    %43 = vector.shape_cast %42 : vector<8xf32> to vector<1x8xf32>
    %cst_14 = arith.constant 2.000000e+01 : f32
    %44 = vector.broadcast %cst_14 : f32 to vector<1x8xf32>
    %45 = arith.mulf %43, %44 : vector<1x8xf32>
    %46 = arith.subf %40, %45 : vector<1x8xf32>
    %47 = vector.shape_cast %46 : vector<1x8xf32> to vector<1x1x8xf32>
    %cst_15 = arith.constant dense<0.000000e+00> : vector<1xf32>
    %48 = vector.multi_reduction <add>, %47, %cst_15 [1, 2] : vector<1x1x8xf32> to vector<1xf32>
    %49 = vector.shape_cast %48 : vector<1xf32> to vector<1x1x1xf32>
    %50 = vector.extract %49[0, 0, 0] : f32 from vector<1x1x1xf32>
    %cst_16 = arith.constant 1.250000e-01 : f32
    %51 = arith.mulf %50, %cst_16 : f32
    %52 = vector.broadcast %51 : f32 to vector<1x1xf32>
    %c0_17 = arith.constant 0 : index
    %c0_18 = arith.constant 0 : index
    %53 = vector.load %arg4[%c0_17, %c0_18] : memref<1x1xf32, #tpu.memory_space<vmem>>, vector<1x1xf32>
    tpu.vector_store %arg4[%c0_17, %c0_18], %52 {strides = array<i32>} : memref<1x1xf32, #tpu.memory_space<vmem>>, vector<1x1xf32>,
    %c0_19 = arith.constant 0 : index
    %c0_20 = arith.constant 0 : index
    %54 = vector.load %arg5[%c0_19, %c0_20] : memref<1x8xf32, #tpu.memory_space<vmem>>, vector<1x8xf32>
    tpu.vector_store %arg5[%c0_19, %c0_20], %43 {strides = array<i32>} : memref<1x8xf32, #tpu.memory_space<vmem>>, vector<1x8xf32>,
    return
  }
}

</mosaic_0001>

<bundles_post_ra>
// kernel: simcse_forward.1
= control target key start
LH: loop header
LB: loop body
LE: loop exit
PB: predicated region body
PF: predicated region fallthrough
CT: control target
= control target key end

     0   :  { %11 = vsyncpa [#allocation3], 0  ;;  %s616_s0 = inlined_call_operand.vmem [shape: f32[16,128], index: 0, kind: input, shape index: {}]   ;;  %s617_s1 = inlined_call_operand.hbm [shape: f32[128,128], index: 1, kind: input, shape index: {}]   ;;  %s618_s2 = inlined_call_operand.vmem [shape: f32[1,128], index: 2, kind: input, shape index: {}]   ;;  %s619_s3 = inlined_call_operand.vmem [shape: s32[1,8], index: 3, kind: input, shape index: {}]   ;;  %s620_s4 = inlined_call_operand.hbm [shape: f32[1,1], index: 4, kind: output, shape index: {0}]   ;;  %s621_s5 = inlined_call_operand.hbm [shape: f32[1,8], index: 5, kind: output, shape index: {1}]  }
   0x1   :  { %12 = vsyncpa [#allocation4], 0 }
   0x2   :  { %13 = vsyncpa [#allocation7], 0  ;;  %s526_s18 = smov [#allocation2]   ;;  %s454_s22 = scalar_lea.hbm %s617_s1, 2048 }
   0x3   :  { %s21_s19 = sshll.u32 %s526_s18, 4  ;;  %p455_p0 = scmp.ne.s32.totalorder %s617_s1, %s454_s22  ;;  %s22_s19 = int_to_ptr.vmem [resolvable:$true] %s21_s19 }
   0x4   :  { %p458_p1 = scmp.lt.u32.totalorder %s454_s22, %s617_s1 }
   0x6   :  { %p460_p2 = pnand %p458_p1, %p455_p0 }
   0x8   :  { %463 = shalt.err (!%p460_p2)
}
   0x9   :  { %s464_s27 = scalar_lea.vmem %s22_s19, 2048  ;;  %p469_p4 = scmp.lt.s32.totalorder %s22_s19, %s22_s19 }
   0xa   :  { %p465_p3 = scmp.ne.s32.totalorder %s22_s19, %s464_s27  ;;  %p470_p5 = scmp.lt.s32.totalorder %s464_s27, %s464_s27 }
   0xc   :  { %p471_p6 = por %p470_p5, %p469_p4 }
   0xe   :  { %p472_p7 = pnand %p471_p6, %p465_p3 }
  0x10   :  { %475 = shalt.err (!%p472_p7)
}
  0x11   :  { %s527_s28 = smov 128   ;;  %s528_s29 = smov 8  }
  0x12   :  { %27 = dma.hbm_to_vmem [thread:$0]  %s617_s1, 2048, %s22_s19, [#allocation3], %s527_s28, %s527_s28, %s528_s29  }
  0x13   :  { %520 = dma.done.wait [#allocation3], 2048  }
  0x14   :  { %521 = vsyncadd [#allocation3], 4294965248  ;;  %v37_v0 = vld [vmem:[#allocation2] sm:$0xff]  ;;  %v38_v1 = vld [vmem:[#allocation2 + $0x8] sm:$0xff]  ;;  %v529_v26 = vmov 0.0   ;;  %vm530_vm0 = vmmov 0   ;;  %v245_v39 = vlaneseq }
  0x15   :  { %v39_v2 = vld [vmem:[#allocation2 + $0x10] sm:$0xff]  ;;  %v403_v3 = vpack.c.bf16 %v38_v1, %v37_v0  ;;  %v40_v4 = vld [vmem:[#allocation2 + $0x18] sm:$0xff]  ;;  %v35_v6 = vld [vmem:[%s616_s0] sm:$0xff]  ;;  %398 = vmatprep.subr.mxu1 %v529_v26  ;;  %400 = vmatprep.mubr.msk.f32.mxu1 %vm530_vm0, %v529_v26  ;;  %vm264_vm2 = vcmask 64512   ;;  %vm295_vm3 = vcmask 57344  }
  0x16   :  { %v407_v5 = vpack.c.bf16 %v40_v4, %v39_v2  ;;  %v41_v7 = vld [vmem:[#allocation2 + $0x20] sm:$0xff]  ;;  %v42_v8 = vld [vmem:[#allocation2 + $0x28] sm:$0xff]  ;;  %395 = vmatprep.mubr.f32.mxu0 %v35_v6  ;;  %v43_v10 = vld [vmem:[#allocation2 + $0x30] sm:$0xff]  ;;  %v246_v40 = vshrl.u32 %v245_v39, 7 }
  0x17   :  { %404 = vmatprep.subr.bf16.mxu0 %v403_v3  ;;  %v411_v9 = vpack.c.bf16 %v42_v8, %v41_v7  ;;  %v44_v11 = vld [vmem:[#allocation2 + $0x38] sm:$0xff]  ;;  %v45_v13 = vld [vmem:[#allocation2 + $0x40] sm:$0xff]  ;;  %v46_v14 = vld [vmem:[#allocation2 + $0x48] sm:$0xff] }
  0x18   :  { %406 = vmatpush3.bf16.xpose.msra.mxu0 %v403_v3  ;;  %v415_v12 = vpack.c.bf16 %v44_v11, %v43_v10  ;;  %v419_v15 = vpack.c.bf16 %v46_v14, %v45_v13  ;;  %v47_v16 = vld [vmem:[#allocation2 + $0x50] sm:$0xff]  ;;  %v48_v17 = vld [vmem:[#allocation2 + $0x58] sm:$0xff]  ;;  %v49_v19 = vld [vmem:[#allocation2 + $0x60] sm:$0xff]  ;;  %v247_v41 = vsub.s32 0, %v246_v40 }
  0x19   :  { %408 = vmatprep.subr.bf16.mxu0 %v407_v5  ;;  %v423_v18 = vpack.c.bf16 %v48_v17, %v47_v16  ;;  %v50_v20 = vld [vmem:[#allocation2 + $0x68] sm:$0xff]  ;;  %v51_v22 = vld [vmem:[#allocation2 + $0x70] sm:$0xff]  ;;  %v52_v23 = vld [vmem:[#allocation2 + $0x78] sm:$0xff] }
  0x1a   :  { %v427_v21 = vpack.c.bf16 %v50_v20, %v49_v19  ;;  %v431_v24 = vpack.c.bf16 %v52_v23, %v51_v22  ;;  %v36_v25 = vld [vmem:[%s616_s0 + $0x8] sm:$0xff]  ;;  %v340_v27 = vld [vmem:[%s618_s2] ss:$0 sm:$0xff] }
  0x1b   :  { %v341_v46 = vld [vmem:[%s619_s3] ss:$0 sm:$0xff]  ;;  %s531_s3 = smov [#allocation6]  }
  0x1c   :  { %vm260_vm1 = vcmp.eq.s32.totalorder %v246_v40, %v341_v46  ;;  %s327_s12 = sshll.u32 %s531_s3, 4  ;;  %s328_s12 = int_to_ptr.vmem [resolvable:$true] %s327_s12 }
  0x1d   :  { %v342_v49 = vsel %vm260_vm1, 1.0, %v529_v26  ;;  %s476_s13 = scalar_lea.vmem %s328_s12, 16  ;;  %s480_s14 = scalar_lea.vmem %s328_s12, 32 }
  0x1e   :  { %p477_p8 = scmp.ne.s32.totalorder %s328_s12, %s476_s13  ;;  %p481_p9 = scmp.lt.s32.totalorder %s328_s12, %s328_s12 }
  0x1f   :  { %p482_p10 = scmp.lt.s32.totalorder %s480_s14, %s476_s13 }
  0x20   :  { %410 = vmatpush3.bf16.xpose.msra.mxu0 %v407_v5 }
  0x21   :  { %412 = vmatprep.subr.bf16.mxu0 %v411_v9  ;;  %p483_p11 = por %p482_p10, %p481_p9 }
  0x23   :  { %p484_p12 = pnand %p483_p11, %p477_p8 }
  0x28   :  { %414 = vmatpush3.bf16.xpose.msra.mxu0 %v411_v9 }
  0x29   :  { %416 = vmatprep.subr.bf16.mxu0 %v415_v12 }
  0x30   :  { %418 = vmatpush3.bf16.xpose.msra.mxu0 %v415_v12 }
  0x31   :  { %420 = vmatprep.subr.bf16.mxu0 %v419_v15 }
  0x38   :  { %422 = vmatpush3.bf16.xpose.msra.mxu0 %v419_v15 }
  0x39   :  { %424 = vmatprep.subr.bf16.mxu0 %v423_v18 }
  0x40   :  { %426 = vmatpush3.bf16.xpose.msra.mxu0 %v423_v18 }
  0x41   :  { %428 = vmatprep.subr.bf16.mxu0 %v427_v21 }
  0x48   :  { %430 = vmatpush3.bf16.xpose.msra.mxu0 %v427_v21 }
  0x49   :  { %432 = vmatprep.subr.bf16.mxu0 %v431_v24 }
  0x50   :  { %434 = vmatpush3.bf16.xpose.msra.mxu0 %v431_v24 }
  0x57   :  { %396 = vmatmul.mubr.f32.vlgmr.msra.gmra.mrb[0].mxu0 %v36_v25 }
 0x12a   :  { %v397_v28 = vpop.f32.mrb[0].mxu0 }
 0x12b   :  { %v126_v29 = vpop.f32.mrb[1].mxu0  ;;  %v132_v30 = vadd.f32 %v397_v28, %v340_v27 }
 0x12c   :  { %v127_v31 = vadd.f32 %v340_v27, %v126_v29 }
 0x12e   :  { %444 = vtanh.f32 %v127_v31 }
 0x12f   :  { %446 = vtanh.f32 %v132_v30 }
 0x138   :  { %v445_v32 = vpop.eup %444 }
 0x139   :  { %399 = vmatpush3.xpose.msra.mxu1 %v445_v32  ;;  %v207_v33 = vmul.f32 %v445_v32, %v445_v32  ;;  %v447_v34 = vpop.eup %446 }
 0x13a   :  { %v208_v35 = vmul.f32 %v447_v34, %v447_v34 }
 0x13b   :  { %209 = vadd.xlane.f32.xlu0 %v207_v33 }
 0x13c   :  { %401 = vmatmul.mubr.f32.vlgmr.msra.gmra.mrb[0].mxu1 %v447_v34 }
 0x13f   :  { %211 = vadd.xlane.f32.xlu0 %v208_v35 }
 0x1c8   :  { %v210_v36 = vpop.xlane.xlu0 %209 }
 0x1c9   :  { %213 = vxpose.xlu1.b32.start.end [1/1] (short) (narrow) %v210_v36, 8 }
 0x1cc   :  { %v212_v44 = vpop.xlane.xlu0 %211 }
 0x20f   :  { %v203_v37 = vpop.f32.mrb[0].mxu1 }
 0x210   :  { %v402_v38 = vpop.f32.mrb[1].mxu1 }
 0x249   :  { %v229_v42 = vpop.trf.xlu1 }
 0x24a   :  { %v248_v43 = vrot.slane %v229_v42, %v247_v41 }
 0x24c   :  { %v249_v45 = vmul.f32 %v248_v43, %v212_v44 }
 0x24e   :  { %448 = vrsqrt.f32 %v249_v45 }
 0x258   :  { %v449_v47 = vpop.eup %448 }
 0x259   :  { %v251_v48 = vmin.f32 %v449_v47, 1e+08 }
 0x25b   :  { %v252_v50 = vmul.f32 %v251_v48, %v203_v37 }
 0x25d   :  { %v263_v51 = vmul.f32 20.0, %v252_v50  ;;  %v285_v52 = vmul.f32 %v342_v49, %v252_v50 }
 0x25f   :  { %v265_v53 = vsel %vm264_vm2, %v263_v51, -inf  ;;  %v286_v54 = vsel %vm264_vm2, %v285_v52, 0.0 }
 0x260   :  { %v266_v55 = vrot.slane %v265_v53, 4  ;;  %v287_v56 = vrot.slane %v286_v54, 4 }
 0x262   :  { %v267_v57 = vmax.f32 %v265_v53, %v266_v55  ;;  %v288_v58 = vadd.f32 %v287_v56, %v286_v54 }
 0x264   :  { %v268_v59 = vrot.slane %v267_v57, 2  ;;  %v289_v60 = vrot.slane %v288_v58, 2 }
 0x266   :  { %v269_v61 = vmax.f32 %v267_v57, %v268_v59  ;;  %v290_v62 = vadd.f32 %v289_v60, %v288_v58 }
 0x268   :  { %v270_v63 = vrot.slane %v269_v61, 1  ;;  %v291_v0 = vrot.slane %v290_v62, 1 }
 0x26a   :  { %v271_v1 = vmax.f32 %v269_v61, %v270_v63  ;;  %v292_v2 = vadd.f32 %v291_v0, %v290_v62 }
 0x26c   :  { %v272_v3 = vsub.f32 %v263_v51, %v271_v1  ;;  %310 = vst.msk [vmem:[#allocation6] sm:$0x1] %vm295_vm3, %v292_v2  ;;  %v293_v16 = vmul.f32 20.0, %v292_v2 }
 0x26e   :  { %v273_v4 = vmul.f32 1.442695, %v272_v3 }
 0x270   :  { %450 = vpow2.f32 %v273_v4 }
 0x27a   :  { %v451_v5 = vpop.eup %450 }
 0x27b   :  { %v275_v6 = vsel %vm264_vm2, %v451_v5, 0.0 }
 0x27c   :  { %v276_v7 = vrot.slane %v275_v6, 4 }
 0x27e   :  { %v277_v8 = vadd.f32 %v276_v7, %v275_v6 }
 0x280   :  { %v278_v9 = vrot.slane %v277_v8, 2 }
 0x282   :  { %v279_v10 = vadd.f32 %v278_v9, %v277_v8 }
 0x284   :  { %v280_v11 = vrot.slane %v279_v10, 1 }
 0x286   :  { %v281_v12 = vadd.f32 %v280_v11, %v279_v10 }
 0x288   :  { %452 = vlog2.f32 %v281_v12 }
 0x292   :  { %v453_v13 = vpop.eup %452 }
 0x293   :  { %v283_v14 = vmul.f32 0.6931472, %v453_v13 }
 0x295   :  { %v284_v15 = vadd.f32 %v283_v14, %v271_v1 }
 0x297   :  { %v294_v17 = vsub.f32 %v284_v15, %v293_v16 }
 0x299   :  { %v296_v18 = vsel %vm295_vm3, %v294_v17, 0.0 }
 0x29a   :  { %297 = vadd.xlane.f32.xlu1 %v296_v18 }
 0x29b   :  { %487 = shalt.err (!%p484_p12)
}
 0x29c   :  { %s488_s17 = scalar_lea.hbm %s621_s5, 16 }
 0x29d   :  { %p489_p13 = scmp.ne.s32.totalorder %s621_s5, %s488_s17  ;;  %p492_p0 = scmp.lt.u32.totalorder %s488_s17, %s621_s5 }
 0x29f   :  { %p494_p1 = pnand %p492_p0, %p489_p13 }
 0x2a1   :  { %497 = shalt.err (!%p494_p1)
}
 0x2a2   :  { %330 = dma.vmem_to_hbm [thread:$0]  %s328_s12, 16, %s621_s5, [#allocation7]   ;;  %vm308_vm4 = vcmask 0  }
 0x2a3   :  { %s532_s24 = smov [#allocation5]  }
 0x2a4   :  { %s317_s25 = sshll.u32 %s532_s24, 4  ;;  %s318_s25 = int_to_ptr.vmem [resolvable:$true] %s317_s25 }
 0x2a5   :  { %s498_s28 = scalar_lea.vmem %s318_s25, 16  ;;  %s502_s29 = scalar_lea.vmem %s318_s25, 32 }
 0x2a6   :  { %p499_p2 = scmp.ne.s32.totalorder %s318_s25, %s498_s28  ;;  %p503_p3 = scmp.lt.s32.totalorder %s318_s25, %s318_s25 }
 0x2a7   :  { %p504_p4 = scmp.lt.s32.totalorder %s502_s29, %s498_s28 }
 0x2a9   :  { %p505_p5 = por %p504_p4, %p503_p3 }
 0x2ab   :  { %p506_p6 = pnand %p505_p5, %p499_p2 }
 0x327   :  { %v298_v19 = vpop.xlane.xlu1 %297 }
 0x328   :  { %v299_v20 = vrot.slane %v298_v19, 4 }
 0x32a   :  { %v300_v21 = vadd.f32 %v299_v20, %v298_v19 }
 0x32c   :  { %v301_v22 = vrot.slane %v300_v21, 2 }
 0x32e   :  { %v302_v23 = vadd.f32 %v301_v22, %v300_v21 }
 0x330   :  { %v303_v24 = vrot.slane %v302_v23, 1 }
 0x332   :  { %v304_v25 = vadd.f32 %v303_v24, %v302_v23 }
 0x334   :  { %435 = vpush %v304_v25 }
 0x365   :  { %s436_s26 = spop %435 }
 0x366   :  { %s306_s27 = smul.f32 0.125, %s436_s26 }
 0x368   :  { %v307_v26 = vstv %s306_s27 }
 0x369   :  { %309 = vst.msk [vmem:[#allocation5] sm:$0x1] %vm308_vm4, %v307_v26 }
 0x36a   :  { %509 = shalt.err (!%p506_p6)
}
 0x36b   :  { %s510_s6 = scalar_lea.hbm %s620_s4, 16 }
 0x36c   :  { %p511_p7 = scmp.ne.s32.totalorder %s620_s4, %s510_s6  ;;  %p514_p8 = scmp.lt.u32.totalorder %s510_s6, %s620_s4 }
 0x36e   :  { %p516_p9 = pnand %p514_p8, %p511_p7 }
 0x370   :  { %519 = shalt.err (!%p516_p9)
}
 0x371   :  { %320 = dma.vmem_to_hbm [thread:$0]  %s318_s25, 16, %s620_s4, [#allocation4]  }
 0x372   :  { %522 = dma.done.wait [#allocation4], 16  }
 0x373   :  { %523 = vsyncadd [#allocation4], 4294967280 }
 0x374   :  { %524 = dma.done.wait [#allocation7], 16  }
 0x375   :  { %525 = vsyncadd [#allocation7], 4294967280 }
 0x376   :  { %337 = vsyncpa [#allocation3], 1 }
 0x377   :  { %338 = vsyncpa [#allocation4], 1 }
 0x378   :  { %339 = vsyncpa [#allocation7], 1 }

</bundles_post_ra>
